<compile_context>
chip_gen: v7x
topology: tpu7x:2x2x1
jax: 0.10.0
libtpu: 0.0.40
codegen_flags: <defaults>
</compile_context>

<pallas_src>
import functools

import jax
import jax.numpy as jnp
from jax import lax
from jax.experimental import pallas as pl
from jax.experimental.pallas import tpu as pltpu

_LANES = 128                      # TPU lane width (last dim)
_SUBLANES = 8                     # f32 sublanes per vreg
_MAX_BLOCK_ROWS = 4096            # 4096x128 f32 = 2 MiB per input block per step
_VMEM_LIMIT_BYTES = 32 * 1024 * 1024  # safe on v5e/v6e (128 MiB phys) and v7x (64 MiB)


def _tensorcores_per_chip() -> int:
    """2 on v7x-class chips (2 TCs/chip); 1 on v5e/v6e (and as a safe default)."""
    try:
        kind = jax.devices()[0].device_kind.lower()
    except Exception:
        return 1
    return 2 if ("v7" in kind or "7x" in kind) else 1


def _mse_kernel(pred_ref, tgt_ref, o_ref, acc_ref, *,
                inner: int, nblocks: int, block_rows: int,
                last_block_rows: int, need_mask: bool):
    """Grid (core-split, reduction); per-core (8, 128) partial-sum output."""
    c = pl.program_id(0)  # core-split axis
    j = pl.program_id(1)  # reduction axis

    @pl.when(j == 0)
    def _():
        acc_ref[...] = jnp.zeros_like(acc_ref)

    # Upcast in-kernel (inputs stream through HBM in their native dtype).
    d = pred_ref[...].astype(jnp.float32) - tgt_ref[...].astype(jnp.float32)

    def accumulate(x):
        # Fold the block into one vreg-shaped (8, 128) partial. The leading-axis
        # sum is pure VALU (no cross-lane XLU work) and removes the per-vreg
        # accumulator load/store of a full-block accumulator.
        acc_ref[...] += (x * x).reshape(
            block_rows // _SUBLANES, _SUBLANES, _LANES).sum(axis=0)

    if need_mask:
        blk = c * inner + j
        is_edge = blk >= nblocks - 1

        @pl.when(is_edge)
        def _():
            # Valid rows in this block: the last real block keeps
            # `last_block_rows`; clamped duplicate blocks (blk >= nblocks) keep
            # none. Only small local indices -> no int32-overflow risk.
            limit = jnp.where(blk == nblocks - 1, last_block_rows, 0)
            local = lax.broadcasted_iota(jnp.int32, d.shape, 0)
            accumulate(jnp.where(local < limit, d, 0.0))

        @pl.when(blk < nblocks - 1)
        def _():
            accumulate(d)
    else:
        accumulate(d)

    @pl.when(j == inner - 1)
    def _():
        # Tiny per-core writeback; cross-sublane/core reduce happens in JAX.
        o_ref[...] = acc_ref[...][None]


def mse_loss_pallas(pred: jax.Array, target: jax.Array, *,
                    max_block_rows: int = _MAX_BLOCK_ROWS) -> jax.Array:
    """Equivalent of torch.nn.functional.mse_loss(pred, target) (mean reduction)."""
    assert pred.shape == target.shape, "mse_loss requires matching shapes"
    assert max_block_rows % _SUBLANES == 0
    n = pred.size

    p = pred.reshape(-1)    # native dtype: no wrapper-side f32 copy
    t = target.reshape(-1)

    # Pad to a multiple of 8*128 so rows (and hence block_rows) are always a
    # multiple of the f32 sublane count. Rare small-pad case; zeros are equal
    # in both operands so they contribute 0 while the mean divides by true n.
    pad = (-n) % (_SUBLANES * _LANES)
    if pad:
        p = jnp.pad(p, (0, pad))
        t = jnp.pad(t, (0, pad))
    rows = (n + pad) // _LANES
    p2 = p.reshape(rows, _LANES)
    t2 = t.reshape(rows, _LANES)

    # Block rows: full array if it is small, else large fixed blocks.
    block_rows = rows if rows <= max_block_rows else max_block_rows
    nblocks = pl.cdiv(rows, block_rows)

    # Only split the stream across cores when the chip actually has 2 TCs
    # (v7x). On v5e/v6e it would just add a duplicate-block DMA + masking.
    nsplit = 2 if (nblocks >= 2 and _tensorcores_per_chip() >= 2) else 1
    inner = pl.cdiv(nblocks, nsplit)
    need_mask = (nsplit * inner * block_rows) != rows
    last_block_rows = rows - (nblocks - 1) * block_rows

    def in_map(c, j):
        # Clamp so no fully out-of-bounds DMA is ever issued; the in-kernel
        # edge mask zeroes any duplicated/out-of-range rows.
        return (jnp.minimum(c * inner + j, nblocks - 1), 0)

    kernel = functools.partial(
        _mse_kernel,
        inner=inner,
        nblocks=nblocks,
        block_rows=block_rows,
        last_block_rows=last_block_rows,
        need_mask=need_mask,
    )

    # Genuinely shard the core-split axis across the 2 TCs on v7x.
    core_sem = (getattr(pltpu, "CORE_PARALLEL", pltpu.PARALLEL)
                if nsplit == 2 else pltpu.ARBITRARY)

    partials = pl.pallas_call(
        kernel,
        out_shape=jax.ShapeDtypeStruct((nsplit, _SUBLANES, _LANES), jnp.float32),
        grid_spec=pltpu.PrefetchScalarGridSpec(
            num_scalar_prefetch=0,
            grid=(nsplit, inner),
            in_specs=[
                pl.BlockSpec((block_rows, _LANES), in_map),
                pl.BlockSpec((block_rows, _LANES), in_map),
            ],
            out_specs=pl.BlockSpec((1, _SUBLANES, _LANES), lambda c, j: (c, 0, 0)),
            scratch_shapes=[pltpu.VMEM((_SUBLANES, _LANES), jnp.float32)],
        ),
        compiler_params=pltpu.CompilerParams(
            dimension_semantics=(core_sem, pltpu.ARBITRARY),
            vmem_limit_bytes=_VMEM_LIMIT_BYTES,
        ),
    )(p2, t2)

    # Tiny final cross-lane/sublane/core reduce in plain JAX.
    return jnp.sum(partials) * jnp.float32(1.0 / n)


def mse_loss_forward(fix: dict, mov: dict, reg: dict, deform_space: jax.Array) -> jax.Array:
    """Mirrors MSELoss.forward(fix, mov, reg, deform_space)."""
    return mse_loss_pallas(reg["img"], fix["img"])


if __name__ == "__main__":
    key = jax.random.PRNGKey(0)
    k1, k2, k3, k4 = jax.random.split(key, 4)

    # Small NCHW-like volumes, consistent with registration image tensors.
    B, C, H, W = 2, 4, 16, 16
    fix_img = jax.random.normal(k1, (B, C, H, W), dtype=jnp.float32)
    reg_img = jax.random.normal(k2, (B, C, H, W), dtype=jnp.float32)
    deform_space = jnp.zeros((B, 2, H, W), dtype=jnp.float32)  # unused by MSELoss

    fix = {"img": fix_img}
    mov = {"img": fix_img}  # unused by MSELoss
    reg = {"img": reg_img}

    loss = mse_loss_forward(fix, mov, reg, deform_space)
    loss = jax.block_until_ready(loss)

    ref = jnp.mean((reg_img - fix_img) ** 2)
    assert jnp.allclose(loss, ref, rtol=1e-5, atol=1e-6), (loss, ref)

    # Extra check: ragged element count + multi-block grid to exercise the
    # gated edge-mask path (tiny blocks forced only for this test).
    a = jax.random.normal(k3, (1, 3, 25, 40), dtype=jnp.float32)  # n = 3000
    b = jax.random.normal(k4, (1, 3, 25, 40), dtype=jnp.float32)
    loss2 = jax.block_until_ready(mse_loss_pallas(a, b, max_block_rows=16))
    ref2 = jnp.mean((a - b) ** 2)
    assert jnp.allclose(loss2, ref2, rtol=1e-5, atol=1e-6), (loss2, ref2)

    print("KERNEL_OK")
</pallas_src>

<mosaic_0001>
module attributes {stable_mosaic.version = 11 : i64} {
  func.func @_mse_kernel(%arg0: i32, %arg1: i32, %arg2: memref<16x128xf32, #tpu.memory_space<vmem>>, %arg3: memref<16x128xf32, #tpu.memory_space<vmem>>, %arg4: memref<1x8x128xf32, #tpu.memory_space<vmem>>, %arg5: memref<8x128xf32, #tpu.memory_space<vmem>>) attributes {dimension_semantics = [#tpu.dimension_semantics<arbitrary>, #tpu.dimension_semantics<arbitrary>], iteration_bounds = array<i64: 1, 1>, scalar_prefetch = 0 : i64, scratch_operands = 1 : i64, tpu.core_type = #tpu.core_type<tc>, window_params = [{transform_indices = @transform_0, window_bounds = array<i64: 16, 128>}, {transform_indices = @transform_1, window_bounds = array<i64: 16, 128>}, {transform_indices = @transform_2, window_bounds = array<i64: 1, 8, 128>}]} {
    %c0_i32 = arith.constant 0 : i32
    %0 = arith.cmpi eq, %arg1, %c0_i32 : i32
    %1 = arith.extui %0 : i1 to i32
    %c0_i32_0 = arith.constant 0 : i32
    %2 = arith.cmpi ne, %1, %c0_i32_0 : i32
    scf.if %2 {
      %cst_10 = arith.constant 0.000000e+00 : f32
      %15 = vector.broadcast %cst_10 : f32 to vector<8x128xf32>
      %c0_11 = arith.constant 0 : index
      %c0_12 = arith.constant 0 : index
      %16 = vector.load %arg5[%c0_11, %c0_12] : memref<8x128xf32, #tpu.memory_space<vmem>>, vector<8x128xf32>
      tpu.vector_store %arg5[%c0_11, %c0_12], %15 {strides = array<i32>} : memref<8x128xf32, #tpu.memory_space<vmem>>, vector<8x128xf32>,
    } else {
    }
    %c0 = arith.constant 0 : index
    %c0_1 = arith.constant 0 : index
    %3 = vector.load %arg2[%c0, %c0_1] : memref<16x128xf32, #tpu.memory_space<vmem>>, vector<16x128xf32>
    %c0_2 = arith.constant 0 : index
    %c0_3 = arith.constant 0 : index
    %4 = vector.load %arg3[%c0_2, %c0_3] : memref<16x128xf32, #tpu.memory_space<vmem>>, vector<16x128xf32>
    %5 = arith.subf %3, %4 : vector<16x128xf32>
    %c0_4 = arith.constant 0 : index
    %c0_5 = arith.constant 0 : index
    %6 = vector.load %arg5[%c0_4, %c0_5] : memref<8x128xf32, #tpu.memory_space<vmem>>, vector<8x128xf32>
    %7 = arith.mulf %5, %5 : vector<16x128xf32>
    %8 = vector.shape_cast %7 : vector<16x128xf32> to vector<2x8x128xf32>
    %cst = arith.constant dense<0.000000e+00> : vector<8x128xf32>
    %9 = vector.multi_reduction <add>, %8, %cst [0] : vector<2x8x128xf32> to vector<8x128xf32>
    %10 = arith.addf %6, %9 : vector<8x128xf32>
    %c0_6 = arith.constant 0 : index
    %c0_7 = arith.constant 0 : index
    %11 = vector.load %arg5[%c0_6, %c0_7] : memref<8x128xf32, #tpu.memory_space<vmem>>, vector<8x128xf32>
    tpu.vector_store %arg5[%c0_6, %c0_7], %10 {strides = array<i32>} : memref<8x128xf32, #tpu.memory_space<vmem>>, vector<8x128xf32>,
    %c0_i32_8 = arith.constant 0 : i32
    %12 = arith.cmpi eq, %arg1, %c0_i32_8 : i32
    %13 = arith.extui %12 : i1 to i32
    %c0_i32_9 = arith.constant 0 : i32
    %14 = arith.cmpi ne, %13, %c0_i32_9 : i32
    scf.if %14 {
      %c0_10 = arith.constant 0 : index
      %c0_11 = arith.constant 0 : index
      %15 = vector.load %arg5[%c0_10, %c0_11] : memref<8x128xf32, #tpu.memory_space<vmem>>, vector<8x128xf32>
      %16 = vector.shape_cast %15 : vector<8x128xf32> to vector<1x8x128xf32>
      %c0_12 = arith.constant 0 : index
      %c0_13 = arith.constant 0 : index
      %c0_14 = arith.constant 0 : index
      %17 = vector.load %arg4[%c0_12, %c0_13, %c0_14] : memref<1x8x128xf32, #tpu.memory_space<vmem>>, vector<1x8x128xf32>
      tpu.vector_store %arg4[%c0_12, %c0_13, %c0_14], %16 {strides = array<i32>} : memref<1x8x128xf32, #tpu.memory_space<vmem>>, vector<1x8x128xf32>,
    } else {
    }
    return
  }
  func.func @transform_0(%arg0: i32, %arg1: i32) -> (i32, i32) {
    %c1_i32 = arith.constant 1 : i32
    %0 = arith.muli %arg0, %c1_i32 : i32
    %1 = arith.addi %0, %arg1 : i32
    %c0_i32 = arith.constant 0 : i32
    %2 = arith.minsi %1, %c0_i32 : i32
    %c0_i32_0 = arith.constant 0 : i32
    %c0_i32_1 = arith.constant 0 : i32
    return %2, %c0_i32_0 : i32, i32
  }
  func.func @transform_1(%arg0: i32, %arg1: i32) -> (i32, i32) {
    %c1_i32 = arith.constant 1 : i32
    %0 = arith.muli %arg0, %c1_i32 : i32
    %1 = arith.addi %0, %arg1 : i32
    %c0_i32 = arith.constant 0 : i32
    %2 = arith.minsi %1, %c0_i32 : i32
    %c0_i32_0 = arith.constant 0 : i32
    %c0_i32_1 = arith.constant 0 : i32
    return %2, %c0_i32_0 : i32, i32
  }
  func.func @transform_2(%arg0: i32, %arg1: i32) -> (i32, i32, i32) {
    %c0_i32 = arith.constant 0 : i32
    %c0_i32_0 = arith.constant 0 : i32
    %c0_i32_1 = arith.constant 0 : i32
    return %arg0, %c0_i32, %c0_i32_0 : i32, i32, i32
  }
}

</mosaic_0001>

<bundles_post_ra>
// kernel: tpu_custom_call.1
= control target key start
LH: loop header
LB: loop body
LE: loop exit
PB: predicated region body
PF: predicated region fallthrough
CT: control target
= control target key end

     0   :  { %7 = vsyncpa [#allocation4], 0  ;;  %s235_s0 = inlined_call_operand.hbm [shape: f32[16,128], index: 0, kind: input, shape index: {}]   ;;  %s236_s1 = inlined_call_operand.hbm [shape: f32[16,128], index: 1, kind: input, shape index: {}]   ;;  %s237_s2 = inlined_call_operand.hbm [shape: f32[1,8,128], index: 2, kind: output, shape index: {}]  }
   0x1   :  { %8 = vsyncpa [#allocation7], 0 }
   0x2   :  { %9 = vsyncpa [#allocation5], 0  ;;  %s179_s9 = smov [#allocation3]   ;;  %s107_s13 = scalar_lea.hbm %s235_s0, 256 }
   0x3   :  { %s21_s10 = sshll.u32 %s179_s9, 4  ;;  %p108_p0 = scmp.ne.s32.totalorder %s235_s0, %s107_s13  ;;  %s22_s10 = int_to_ptr.vmem [resolvable:$true] %s21_s10 }
   0x4   :  { %p111_p1 = scmp.lt.u32.totalorder %s107_s13, %s235_s0 }
   0x6   :  { %p113_p2 = pnand %p111_p1, %p108_p0 }
   0x8   :  { %116 = shalt.err (!%p113_p2)
}
   0x9   :  { %s117_s18 = scalar_lea.vmem %s22_s10, 256  ;;  %p122_p4 = scmp.lt.s32.totalorder %s22_s10, %s22_s10 }
   0xa   :  { %p118_p3 = scmp.ne.s32.totalorder %s22_s10, %s117_s18  ;;  %p123_p5 = scmp.lt.s32.totalorder %s117_s18, %s117_s18 }
   0xc   :  { %p124_p6 = por %p123_p5, %p122_p4 }
   0xe   :  { %p125_p7 = pnand %p124_p6, %p118_p3 }
  0x10   :  { %128 = shalt.err (!%p125_p7)
}
  0x11   :  { %s180_s19 = smov 128   ;;  %s181_s20 = smov 8  }
  0x12   :  { %27 = dma.hbm_to_vmem [thread:$0]  %s235_s0, 256, %s22_s10, [#allocation4], %s180_s19, %s180_s19, %s181_s20  }
  0x13   :  { %s182_s23 = smov [#allocation6]   ;;  %s129_s27 = scalar_lea.hbm %s236_s1, 256 }
  0x14   :  { %s39_s24 = sshll.u32 %s182_s23, 4  ;;  %p130_p8 = scmp.ne.s32.totalorder %s236_s1, %s129_s27  ;;  %s40_s24 = int_to_ptr.vmem [resolvable:$true] %s39_s24 }
  0x15   :  { %p133_p9 = scmp.lt.u32.totalorder %s129_s27, %s236_s1 }
  0x17   :  { %p135_p10 = pnand %p133_p9, %p130_p8 }
  0x19   :  { %138 = shalt.err (!%p135_p10)
}
  0x1a   :  { %s139_s4 = scalar_lea.vmem %s40_s24, 256  ;;  %p144_p12 = scmp.lt.s32.totalorder %s40_s24, %s40_s24 }
  0x1b   :  { %p140_p11 = scmp.ne.s32.totalorder %s40_s24, %s139_s4  ;;  %p145_p13 = scmp.lt.s32.totalorder %s139_s4, %s139_s4 }
  0x1d   :  { %p146_p0 = por %p145_p13, %p144_p12 }
  0x1f   :  { %p147_p1 = pnand %p146_p0, %p140_p11 }
  0x21   :  { %150 = shalt.err (!%p147_p1)
}
  0x22   :  { %45 = dma.hbm_to_vmem [thread:$0]  %s236_s1, 256, %s40_s24, [#allocation7], %s180_s19, %s180_s19, %s181_s20  }
  0x23   :  { %173 = dma.done.wait [#allocation4], 256  }
  0x24   :  { %174 = vsyncadd [#allocation4], 4294967040 }
  0x25   :  { %175 = dma.done.wait [#allocation7], 256  }
  0x26   :  { %176 = vsyncadd [#allocation7], 4294967040  ;;  %v65_v0 = vld [vmem:[#allocation3] sm:$0xff]  ;;  %v66_v1 = vld [vmem:[#allocation3 + $0x8] sm:$0xff]  ;;  %s183_s6 = smov [#allocation8]  }
  0x27   :  { %v67_v2 = vld [vmem:[#allocation6] sm:$0xff]  ;;  %v68_v3 = vld [vmem:[#allocation6 + $0x8] sm:$0xff]  ;;  %s88_s7 = sshll.u32 %s183_s6, 4  ;;  %s89_s7 = int_to_ptr.vmem [resolvable:$true] %s88_s7 }
  0x28   :  { %v69_v4 = vsub.f32 %v65_v0, %v67_v2  ;;  %v70_v5 = vsub.f32 %v66_v1, %v68_v3  ;;  %s151_s8 = scalar_lea.vmem %s89_s7, 128  ;;  %p156_p3 = scmp.lt.s32.totalorder %s89_s7, %s89_s7 }
  0x29   :  { %p152_p2 = scmp.ne.s32.totalorder %s89_s7, %s151_s8  ;;  %p157_p4 = scmp.lt.s32.totalorder %s151_s8, %s151_s8 }
  0x2a   :  { %v72_v6 = vmul.f32 %v69_v4, %v69_v4  ;;  %v73_v7 = vmul.f32 %v70_v5, %v70_v5 }
  0x2b   :  { %p158_p5 = por %p157_p4, %p156_p3 }
  0x2c   :  { %v74_v8 = vadd.f32 %v73_v7, %v72_v6 }
  0x2d   :  { %p159_p6 = pnand %p158_p5, %p152_p2 }
  0x2e   :  { %81 = vst [vmem:[#allocation8] sm:$0xff] %v74_v8 }
  0x2f   :  { %162 = shalt.err (!%p159_p6)
}
  0x30   :  { %s163_s10 = scalar_lea.hbm %s237_s2, 128 }
  0x31   :  { %p164_p7 = scmp.ne.s32.totalorder %s237_s2, %s163_s10  ;;  %p167_p8 = scmp.lt.u32.totalorder %s163_s10, %s237_s2 }
  0x33   :  { %p169_p9 = pnand %p167_p8, %p164_p7 }
  0x35   :  { %172 = shalt.err (!%p169_p9)
}
  0x36   :  { %91 = dma.vmem_to_hbm [thread:$0]  %s89_s7, 128, %s237_s2, [#allocation5]  }
  0x37   :  { %177 = dma.done.wait [#allocation5], 128  }
  0x38   :  { %178 = vsyncadd [#allocation5], 4294967168 }
  0x39   :  { %95 = vsyncpa [#allocation4], 1 }
  0x3a   :  { %96 = vsyncpa [#allocation7], 1 }
  0x3b   :  { %97 = vsyncpa [#allocation5], 1 }

</bundles_post_ra>
